<compile_context>
chip_gen: v7x
topology: tpu7x:2x2x1
jax: 0.10.0
libtpu: 0.0.40
codegen_flags: <defaults>
</compile_context>

<pallas_src>
import functools

import jax
import jax.numpy as jnp
from jax.experimental import pallas as pl
from jax.experimental.pallas import tpu as pltpu

LN_EPS = 1e-5  # PyTorch nn.LayerNorm default


def _layernorm_f32(x, gamma, beta, eps=LN_EPS):
    """LayerNorm over the last axis in f32, var = E[x^2] - mean^2.

    The two row reductions (sum(x), sum(x*x)) have no serial dependency, so
    they can overlap in the XLU instead of waiting on each other.
    """
    inv_n = 1.0 / x.shape[-1]
    s = jnp.sum(x, axis=-1, keepdims=True)
    sq = jnp.sum(x * x, axis=-1, keepdims=True)
    mean = s * inv_n
    var = sq * inv_n - mean * mean
    inv = jax.lax.rsqrt(var + eps)            # EUP rsqrt
    return (x - mean) * inv * gamma + beta


def actor_kernel(x_ref, w1_ref, b1_ref, g1_ref, be1_ref,
                 w2_ref, b2_ref, g2_ref, be2_ref,
                 w3_ref, b3_ref, o_ref):
    # Layer 1: Linear in f32 (tiny K = state_dim) -> LayerNorm -> ReLU.
    # ReLU is fused into the bf16 downcast that feeds the layer-2 MXU matmul.
    h = jnp.dot(x_ref[...], w1_ref[...], preferred_element_type=jnp.float32)
    h = _layernorm_f32(h + b1_ref[...], g1_ref[...], be1_ref[...])
    h_bf16 = jnp.maximum(h, 0.0).astype(jnp.bfloat16)

    # Layer 2: the dominant 256x256 matmul on the bf16 MXU path, f32 acc.
    h = jnp.dot(h_bf16, w2_ref[...], preferred_element_type=jnp.float32)
    h = _layernorm_f32(h + b2_ref[...], g2_ref[...], be2_ref[...])
    h = jnp.maximum(h, 0.0)

    # Output layer: keep the pre-tanh projection in f32 (small N, tanh is
    # sensitive to pre-activation error near saturation), then tanh (EUP).
    a = jnp.dot(h, w3_ref[...], preferred_element_type=jnp.float32)
    o_ref[...] = jnp.tanh(a + b3_ref[...]).astype(o_ref.dtype)


def _round_up(x, m):
    return ((x + m - 1) // m) * m


def actor_forward(state, params, max_tile_b=2048):
    """Actor.forward(state) as one Pallas call, tiled over the batch axis."""
    w1, b1, g1, be1, w2, b2, g2, be2, w3, b3 = params
    batch, state_dim = state.shape
    hidden = w1.shape[1]
    action_dim = w3.shape[1]

    # --- Batch tiling --------------------------------------------------
    # Round the batch to a multiple of 16 (bf16 packs 16 sublanes/vreg for the
    # layer-2 activations), then split into near-equal tiles: padding waste is
    # bounded by ~16 rows per grid step instead of up to a whole tile.
    padded16 = _round_up(batch, 16)
    n_steps = max(1, (padded16 + max_tile_b - 1) // max_tile_b)
    # Large-enough batches get >= 2 grid steps so the "parallel" axis can
    # shard across both v7x TensorCores (one extra ~0.35 us step elsewhere).
    if padded16 >= 512:
        n_steps = max(n_steps, 2)
    tile_b = _round_up((padded16 + n_steps - 1) // n_steps, 16)
    padded = tile_b * n_steps
    grid = (n_steps,)

    # Single wrapper op at most (pad); no separate whole-batch cast pass —
    # the kernel reads f32 directly.
    x = state
    if padded != batch:
        x = jnp.pad(x, ((0, padded - batch), (0, 0)))

    # Only the dominant layer-2 weights go through the bf16 MXU path.
    w2b = w2.astype(jnp.bfloat16)

    def resident(a):  # whole array, DMA'd once, VMEM-resident across the grid
        return pl.BlockSpec(a.shape, lambda i: (0, 0))

    flops = 2 * padded * (state_dim * hidden + hidden * hidden
                          + hidden * action_dim)
    transcendentals = padded * (action_dim + 2)  # tanh + 2 rsqrt per row
    bytes_accessed = (x.size * 4
                      + (w1.size + w3.size) * 4 + w2b.size * 2
                      + (b1.size + g1.size + be1.size + b2.size + g2.size
                         + be2.size + b3.size) * 4
                      + padded * action_dim * 4)

    out = pl.pallas_call(
        actor_kernel,
        out_shape=jax.ShapeDtypeStruct((padded, action_dim), state.dtype),
        grid=grid,
        in_specs=[pl.BlockSpec((tile_b, state_dim), lambda i: (i, 0)),
                  resident(w1), resident(b1), resident(g1), resident(be1),
                  resident(w2b), resident(b2), resident(g2), resident(be2),
                  resident(w3), resident(b3)],
        out_specs=pl.BlockSpec((tile_b, action_dim), lambda i: (i, 0)),
        compiler_params=pltpu.CompilerParams(
            dimension_semantics=("parallel",),
            vmem_limit_bytes=32 * 1024 * 1024),
        cost_estimate=pl.CostEstimate(flops=flops,
                                      transcendentals=transcendentals,
                                      bytes_accessed=bytes_accessed),
    )(x, w1, b1, g1, be1, w2b, b2, g2, be2, w3, b3)

    return out[:batch]


def init_actor_params(key, state_dim, action_dim, hidden=256):
    """Xavier-uniform Linear weights, zero biases (matches _init_weights).

    LayerNorm affine params get small random perturbations (as after training)
    so the gamma/beta path is actually exercised by the check.
    """
    ks = jax.random.split(key, 7)

    def xavier(k, fan_in, fan_out):
        bound = jnp.sqrt(6.0 / (fan_in + fan_out))
        return jax.random.uniform(k, (fan_in, fan_out), jnp.float32,
                                  -bound, bound)

    w1 = xavier(ks[0], state_dim, hidden)
    b1 = jnp.zeros((1, hidden), jnp.float32)
    w2 = xavier(ks[1], hidden, hidden)
    b2 = jnp.zeros((1, hidden), jnp.float32)
    w3 = xavier(ks[2], hidden, action_dim)
    b3 = jnp.zeros((1, action_dim), jnp.float32)
    g1 = 1.0 + 0.1 * jax.random.normal(ks[3], (1, hidden), jnp.float32)
    be1 = 0.1 * jax.random.normal(ks[4], (1, hidden), jnp.float32)
    g2 = 1.0 + 0.1 * jax.random.normal(ks[5], (1, hidden), jnp.float32)
    be2 = 0.1 * jax.random.normal(ks[6], (1, hidden), jnp.float32)
    return (w1, b1, g1, be1, w2, b2, g2, be2, w3, b3)


def actor_forward_ref(state, params):
    """Pure-JAX f32 reference of the same forward pass."""
    w1, b1, g1, be1, w2, b2, g2, be2, w3, b3 = params

    def ln(x, g, b):
        m = jnp.mean(x, axis=-1, keepdims=True)
        v = jnp.mean(jnp.square(x - m), axis=-1, keepdims=True)
        return (x - m) * jax.lax.rsqrt(v + LN_EPS) * g + b

    h = jnp.maximum(ln(state @ w1 + b1, g1, be1), 0.0)
    h = jnp.maximum(ln(h @ w2 + b2, g2, be2), 0.0)
    return jnp.tanh(h @ w3 + b3)


if __name__ == "__main__":
    key = jax.random.PRNGKey(0)
    k_state, k_params = jax.random.split(key)

    # Small shapes consistent with the module: hidden width 256 is fixed by
    # the spec; state_dim=16, action_dim=4, batch=2 (padded to 16 internally).
    batch, state_dim, action_dim = 2, 16, 4

    state = jax.random.normal(k_state, (batch, state_dim), jnp.float32)
    params = init_actor_params(k_params, state_dim, action_dim)

    actor_jit = jax.jit(functools.partial(actor_forward, max_tile_b=2048))
    action = jax.block_until_ready(actor_jit(state, params))

    ref = actor_forward_ref(state, params)
    assert action.shape == (batch, action_dim)
    # Only the layer-2 matmul operands are bf16 (f32 accumulation), so the
    # deviation vs. the f32 reference is small.
    assert jnp.allclose(action, ref, atol=5e-2, rtol=5e-2), "mismatch vs ref"
    assert bool(jnp.all(jnp.abs(action) <= 1.0)), "tanh range violated"

    print("KERNEL_OK")
</pallas_src>

<mosaic_0001>
module attributes {stable_mosaic.version = 11 : i64} {
  func.func @actor_kernel(%arg0: i32, %arg1: memref<16x16xf32, #tpu.memory_space<vmem>>, %arg2: memref<16x256xf32, #tpu.memory_space<vmem>>, %arg3: memref<1x256xf32, #tpu.memory_space<vmem>>, %arg4: memref<1x256xf32, #tpu.memory_space<vmem>>, %arg5: memref<1x256xf32, #tpu.memory_space<vmem>>, %arg6: memref<256x256xbf16, #tpu.memory_space<vmem>>, %arg7: memref<1x256xf32, #tpu.memory_space<vmem>>, %arg8: memref<1x256xf32, #tpu.memory_space<vmem>>, %arg9: memref<1x256xf32, #tpu.memory_space<vmem>>, %arg10: memref<256x4xf32, #tpu.memory_space<vmem>>, %arg11: memref<1x4xf32, #tpu.memory_space<vmem>>, %arg12: memref<16x4xf32, #tpu.memory_space<vmem>>) attributes {dimension_semantics = [#tpu.dimension_semantics<parallel>], iteration_bounds = array<i64: 1>, scalar_prefetch = 0 : i64, scratch_operands = 0 : i64, tpu.core_type = #tpu.core_type<tc>, window_params = [{transform_indices = @transform_0, window_bounds = array<i64: 16, 16>}, {pipeline_mode = #tpu.pipeline_mode<synchronous>, transform_indices = @transform_1, window_bounds = array<i64: 16, 256>}, {pipeline_mode = #tpu.pipeline_mode<synchronous>, transform_indices = @transform_2, window_bounds = array<i64: 1, 256>}, {pipeline_mode = #tpu.pipeline_mode<synchronous>, transform_indices = @transform_3, window_bounds = array<i64: 1, 256>}, {pipeline_mode = #tpu.pipeline_mode<synchronous>, transform_indices = @transform_4, window_bounds = array<i64: 1, 256>}, {pipeline_mode = #tpu.pipeline_mode<synchronous>, transform_indices = @transform_5, window_bounds = array<i64: 256, 256>}, {pipeline_mode = #tpu.pipeline_mode<synchronous>, transform_indices = @transform_6, window_bounds = array<i64: 1, 256>}, {pipeline_mode = #tpu.pipeline_mode<synchronous>, transform_indices = @transform_7, window_bounds = array<i64: 1, 256>}, {pipeline_mode = #tpu.pipeline_mode<synchronous>, transform_indices = @transform_8, window_bounds = array<i64: 1, 256>}, {pipeline_mode = #tpu.pipeline_mode<synchronous>, transform_indices = @transform_9, window_bounds = array<i64: 256, 4>}, {pipeline_mode = #tpu.pipeline_mode<synchronous>, transform_indices = @transform_10, window_bounds = array<i64: 1, 4>}, {transform_indices = @transform_11, window_bounds = array<i64: 16, 4>}]} {
    %c0 = arith.constant 0 : index
    %c0_0 = arith.constant 0 : index
    %0 = vector.load %arg1[%c0, %c0_0] : memref<16x16xf32, #tpu.memory_space<vmem>>, vector<16x16xf32>
    %c0_1 = arith.constant 0 : index
    %c0_2 = arith.constant 0 : index
    %1 = vector.load %arg2[%c0_1, %c0_2] : memref<16x256xf32, #tpu.memory_space<vmem>>, vector<16x256xf32>
    %cst = arith.constant dense<0.000000e+00> : vector<16x256xf32>
    %2 = tpu.matmul %0, %1, %cst {dimension_numbers = #tpu.dot_dimension_numbers<[1], [0], [0], [1], [0, 0, 1, 1], [], []>} : vector<16x16xf32>, vector<16x256xf32>, vector<16x256xf32> -> vector<16x256xf32>
    %c0_3 = arith.constant 0 : index
    %c0_4 = arith.constant 0 : index
    %3 = vector.load %arg3[%c0_3, %c0_4] : memref<1x256xf32, #tpu.memory_space<vmem>>, vector<1x256xf32>
    %4 = vector.broadcast %3 : vector<1x256xf32> to vector<16x256xf32>
    %5 = arith.addf %2, %4 : vector<16x256xf32>
    %c0_5 = arith.constant 0 : index
    %c0_6 = arith.constant 0 : index
    %6 = vector.load %arg4[%c0_5, %c0_6] : memref<1x256xf32, #tpu.memory_space<vmem>>, vector<1x256xf32>
    %c0_7 = arith.constant 0 : index
    %c0_8 = arith.constant 0 : index
    %7 = vector.load %arg5[%c0_7, %c0_8] : memref<1x256xf32, #tpu.memory_space<vmem>>, vector<1x256xf32>
    %cst_9 = arith.constant dense<0.000000e+00> : vector<16xf32>
    %8 = vector.multi_reduction <add>, %5, %cst_9 [1] : vector<16x256xf32> to vector<16xf32>
    %9 = vector.shape_cast %8 : vector<16xf32> to vector<16x1xf32>
    %10 = arith.mulf %5, %5 : vector<16x256xf32>
    %cst_10 = arith.constant dense<0.000000e+00> : vector<16xf32>
    %11 = vector.multi_reduction <add>, %10, %cst_10 [1] : vector<16x256xf32> to vector<16xf32>
    %12 = vector.shape_cast %11 : vector<16xf32> to vector<16x1xf32>
    %cst_11 = arith.constant 3.906250e-03 : f32
    %13 = vector.broadcast %cst_11 : f32 to vector<16x1xf32>
    %14 = arith.mulf %9, %13 : vector<16x1xf32>
    %cst_12 = arith.constant 3.906250e-03 : f32
    %15 = vector.broadcast %cst_12 : f32 to vector<16x1xf32>
    %16 = arith.mulf %12, %15 : vector<16x1xf32>
    %17 = arith.mulf %14, %14 : vector<16x1xf32>
    %18 = arith.subf %16, %17 : vector<16x1xf32>
    %cst_13 = arith.constant 9.99999974E-6 : f32
    %19 = vector.broadcast %cst_13 : f32 to vector<16x1xf32>
    %20 = arith.addf %18, %19 : vector<16x1xf32>
    %21 = math.rsqrt %20 : vector<16x1xf32>
    %22 = vector.broadcast %14 : vector<16x1xf32> to vector<16x256xf32>
    %23 = arith.subf %5, %22 : vector<16x256xf32>
    %24 = vector.broadcast %21 : vector<16x1xf32> to vector<16x256xf32>
    %25 = arith.mulf %23, %24 : vector<16x256xf32>
    %26 = vector.broadcast %6 : vector<1x256xf32> to vector<16x256xf32>
    %27 = arith.mulf %25, %26 : vector<16x256xf32>
    %28 = vector.broadcast %7 : vector<1x256xf32> to vector<16x256xf32>
    %29 = arith.addf %27, %28 : vector<16x256xf32>
    %cst_14 = arith.constant 0.000000e+00 : f32
    %30 = vector.broadcast %cst_14 : f32 to vector<16x256xf32>
    %31 = arith.maximumf %29, %30 : vector<16x256xf32>
    %32 = arith.truncf %31 : vector<16x256xf32> to vector<16x256xbf16>
    %c0_15 = arith.constant 0 : index
    %c0_16 = arith.constant 0 : index
    %33 = vector.load %arg6[%c0_15, %c0_16] : memref<256x256xbf16, #tpu.memory_space<vmem>>, vector<256x256xbf16>
    %cst_17 = arith.constant dense<0.000000e+00> : vector<16x256xf32>
    %34 = tpu.matmul %32, %33, %cst_17 {dimension_numbers = #tpu.dot_dimension_numbers<[1], [0], [0], [1], [0, 0, 1, 1], [], []>} : vector<16x256xbf16>, vector<256x256xbf16>, vector<16x256xf32> -> vector<16x256xf32>
    %c0_18 = arith.constant 0 : index
    %c0_19 = arith.constant 0 : index
    %35 = vector.load %arg7[%c0_18, %c0_19] : memref<1x256xf32, #tpu.memory_space<vmem>>, vector<1x256xf32>
    %36 = vector.broadcast %35 : vector<1x256xf32> to vector<16x256xf32>
    %37 = arith.addf %34, %36 : vector<16x256xf32>
    %c0_20 = arith.constant 0 : index
    %c0_21 = arith.constant 0 : index
    %38 = vector.load %arg8[%c0_20, %c0_21] : memref<1x256xf32, #tpu.memory_space<vmem>>, vector<1x256xf32>
    %c0_22 = arith.constant 0 : index
    %c0_23 = arith.constant 0 : index
    %39 = vector.load %arg9[%c0_22, %c0_23] : memref<1x256xf32, #tpu.memory_space<vmem>>, vector<1x256xf32>
    %cst_24 = arith.constant dense<0.000000e+00> : vector<16xf32>
    %40 = vector.multi_reduction <add>, %37, %cst_24 [1] : vector<16x256xf32> to vector<16xf32>
    %41 = vector.shape_cast %40 : vector<16xf32> to vector<16x1xf32>
    %42 = arith.mulf %37, %37 : vector<16x256xf32>
    %cst_25 = arith.constant dense<0.000000e+00> : vector<16xf32>
    %43 = vector.multi_reduction <add>, %42, %cst_25 [1] : vector<16x256xf32> to vector<16xf32>
    %44 = vector.shape_cast %43 : vector<16xf32> to vector<16x1xf32>
    %cst_26 = arith.constant 3.906250e-03 : f32
    %45 = vector.broadcast %cst_26 : f32 to vector<16x1xf32>
    %46 = arith.mulf %41, %45 : vector<16x1xf32>
    %cst_27 = arith.constant 3.906250e-03 : f32
    %47 = vector.broadcast %cst_27 : f32 to vector<16x1xf32>
    %48 = arith.mulf %44, %47 : vector<16x1xf32>
    %49 = arith.mulf %46, %46 : vector<16x1xf32>
    %50 = arith.subf %48, %49 : vector<16x1xf32>
    %cst_28 = arith.constant 9.99999974E-6 : f32
    %51 = vector.broadcast %cst_28 : f32 to vector<16x1xf32>
    %52 = arith.addf %50, %51 : vector<16x1xf32>
    %53 = math.rsqrt %52 : vector<16x1xf32>
    %54 = vector.broadcast %46 : vector<16x1xf32> to vector<16x256xf32>
    %55 = arith.subf %37, %54 : vector<16x256xf32>
    %56 = vector.broadcast %53 : vector<16x1xf32> to vector<16x256xf32>
    %57 = arith.mulf %55, %56 : vector<16x256xf32>
    %58 = vector.broadcast %38 : vector<1x256xf32> to vector<16x256xf32>
    %59 = arith.mulf %57, %58 : vector<16x256xf32>
    %60 = vector.broadcast %39 : vector<1x256xf32> to vector<16x256xf32>
    %61 = arith.addf %59, %60 : vector<16x256xf32>
    %cst_29 = arith.constant 0.000000e+00 : f32
    %62 = vector.broadcast %cst_29 : f32 to vector<16x256xf32>
    %63 = arith.maximumf %61, %62 : vector<16x256xf32>
    %c0_30 = arith.constant 0 : index
    %c0_31 = arith.constant 0 : index
    %64 = vector.load %arg10[%c0_30, %c0_31] : memref<256x4xf32, #tpu.memory_space<vmem>>, vector<256x4xf32>
    %cst_32 = arith.constant dense<0.000000e+00> : vector<16x4xf32>
    %65 = tpu.matmul %63, %64, %cst_32 {dimension_numbers = #tpu.dot_dimension_numbers<[1], [0], [0], [1], [0, 0, 1, 1], [], []>} : vector<16x256xf32>, vector<256x4xf32>, vector<16x4xf32> -> vector<16x4xf32>
    %c0_33 = arith.constant 0 : index
    %c0_34 = arith.constant 0 : index
    %66 = vector.load %arg11[%c0_33, %c0_34] : memref<1x4xf32, #tpu.memory_space<vmem>>, vector<1x4xf32>
    %67 = vector.broadcast %66 : vector<1x4xf32> to vector<16x4xf32>
    %68 = arith.addf %65, %67 : vector<16x4xf32>
    %69 = math.tanh %68 : vector<16x4xf32>
    %c0_35 = arith.constant 0 : index
    %c0_36 = arith.constant 0 : index
    %70 = vector.load %arg12[%c0_35, %c0_36] : memref<16x4xf32, #tpu.memory_space<vmem>>, vector<16x4xf32>
    tpu.vector_store %arg12[%c0_35, %c0_36], %69 {strides = array<i32>} : memref<16x4xf32, #tpu.memory_space<vmem>>, vector<16x4xf32>,
    return
  }
  func.func @transform_0(%arg0: i32) -> (i32, i32) {
    %c0_i32 = arith.constant 0 : i32
    %c0_i32_0 = arith.constant 0 : i32
    return %arg0, %c0_i32 : i32, i32
  }
  func.func @transform_1(%arg0: i32) -> (i32, i32) {
    %c0_i32 = arith.constant 0 : i32
    %c0_i32_0 = arith.constant 0 : i32
    %c0_i32_1 = arith.constant 0 : i32
    return %c0_i32, %c0_i32_0 : i32, i32
  }
  func.func @transform_2(%arg0: i32) -> (i32, i32) {
    %c0_i32 = arith.constant 0 : i32
    %c0_i32_0 = arith.constant 0 : i32
    %c0_i32_1 = arith.constant 0 : i32
    return %c0_i32, %c0_i32_0 : i32, i32
  }
  func.func @transform_3(%arg0: i32) -> (i32, i32) {
    %c0_i32 = arith.constant 0 : i32
    %c0_i32_0 = arith.constant 0 : i32
    %c0_i32_1 = arith.constant 0 : i32
    return %c0_i32, %c0_i32_0 : i32, i32
  }
  func.func @transform_4(%arg0: i32) -> (i32, i32) {
    %c0_i32 = arith.constant 0 : i32
    %c0_i32_0 = arith.constant 0 : i32
    %c0_i32_1 = arith.constant 0 : i32
    return %c0_i32, %c0_i32_0 : i32, i32
  }
  func.func @transform_5(%arg0: i32) -> (i32, i32) {
    %c0_i32 = arith.constant 0 : i32
    %c0_i32_0 = arith.constant 0 : i32
    %c0_i32_1 = arith.constant 0 : i32
    return %c0_i32, %c0_i32_0 : i32, i32
  }
  func.func @transform_6(%arg0: i32) -> (i32, i32) {
    %c0_i32 = arith.constant 0 : i32
    %c0_i32_0 = arith.constant 0 : i32
    %c0_i32_1 = arith.constant 0 : i32
    return %c0_i32, %c0_i32_0 : i32, i32
  }
  func.func @transform_7(%arg0: i32) -> (i32, i32) {
    %c0_i32 = arith.constant 0 : i32
    %c0_i32_0 = arith.constant 0 : i32
    %c0_i32_1 = arith.constant 0 : i32
    return %c0_i32, %c0_i32_0 : i32, i32
  }
  func.func @transform_8(%arg0: i32) -> (i32, i32) {
    %c0_i32 = arith.constant 0 : i32
    %c0_i32_0 = arith.constant 0 : i32
    %c0_i32_1 = arith.constant 0 : i32
    return %c0_i32, %c0_i32_0 : i32, i32
  }
  func.func @transform_9(%arg0: i32) -> (i32, i32) {
    %c0_i32 = arith.constant 0 : i32
    %c0_i32_0 = arith.constant 0 : i32
    %c0_i32_1 = arith.constant 0 : i32
    return %c0_i32, %c0_i32_0 : i32, i32
  }
  func.func @transform_10(%arg0: i32) -> (i32, i32) {
    %c0_i32 = arith.constant 0 : i32
    %c0_i32_0 = arith.constant 0 : i32
    %c0_i32_1 = arith.constant 0 : i32
    return %c0_i32, %c0_i32_0 : i32, i32
  }
  func.func @transform_11(%arg0: i32) -> (i32, i32) {
    %c0_i32 = arith.constant 0 : i32
    %c0_i32_0 = arith.constant 0 : i32
    return %arg0, %c0_i32 : i32, i32
  }
}

</mosaic_0001>

<bundles_post_ra>
// kernel: actor_forward.1
= control target key start
LH: loop header
LB: loop body
LE: loop exit
PB: predicated region body
PF: predicated region fallthrough
CT: control target
= control target key end

     0   :  { %v826_v3 = vmov 0.0   ;;  %vm56_vm0 = vcmask 130048   ;;  %v46_v25 = vlaneseq  ;;  %vm649_vm1 = vcmask 31744   ;;  %s1188_s1 = inlined_call_operand.vmem [shape: f32[16,256], index: 1, kind: input, shape index: {}]   ;;  %s1189_s0 = inlined_call_operand.vmem [shape: f32[16,16], index: 0, kind: input, shape index: {}]   ;;  %s1190_s5 = inlined_call_operand.vmem [shape: bf16[256,256], index: 5, kind: input, shape index: {}]   ;;  %s1191_s2 = inlined_call_operand.vmem [shape: f32[1,256], index: 2, kind: input, shape index: {}]   ;;  %s1192_s3 = inlined_call_operand.vmem [shape: f32[1,256], index: 3, kind: input, shape index: {}]   ;;  %s1193_s4 = inlined_call_operand.vmem [shape: f32[1,256], index: 4, kind: input, shape index: {}]   ;;  %s1194_s9 = inlined_call_operand.vmem [shape: f32[256,4], index: 9, kind: input, shape index: {}]   ;;  %s1195_s6 = inlined_call_operand.vmem [shape: f32[1,256], index: 6, kind: input, shape index: {}]   ;;  %s1196_s7 = inlined_call_operand.vmem [shape: f32[1,256], index: 7, kind: input, shape index: {}]   ;;  %s1197_s8 = inlined_call_operand.vmem [shape: f32[1,256], index: 8, kind: input, shape index: {}]   ;;  %s1198_s10 = inlined_call_operand.vmem [shape: f32[1,4], index: 10, kind: input, shape index: {}]   ;;  %s1199_s11 = inlined_call_operand.vmem [shape: f32[16,4], index: 11, kind: output, shape index: {}]  }
   0x1   :  { %v41_v0 = vld [vmem:[%s1188_s1 + $0x8] sm:$0xff]  ;;  %v43_v1 = vld [vmem:[%s1188_s1 + $0x18] sm:$0xff]  ;;  %v40_v2 = vld [vmem:[%s1188_s1] sm:$0xff]  ;;  %127 = vmatprep.mubr.f32.mxu0 %v826_v3 }
   0x2   :  { %v729_v4 = vpack.c.bf16 %v43_v1, %v41_v0  ;;  %v42_v5 = vld [vmem:[%s1188_s1 + $0x10] sm:$0xff]  ;;  %v38_v7 = vld [vmem:[%s1189_s0] sm:$0xff]  ;;  %v39_v8 = vld [vmem:[%s1189_s0 + $0x8] sm:$0xff]  ;;  %v47_v26 = vshrl.u32 %v46_v25, 7 }
   0x3   :  { %v731_v6 = vpack.c.bf16 %v42_v5, %v40_v2  ;;  %v766_v9 = vld [vmem:[%s1190_s5 + $0x4] ss:$8 sps:$4 sm:$0xff]   ;;  %v768_v10 = vld [vmem:[%s1190_s5] ss:$8 sps:$4 sm:$0xff]   ;;  %v769_v11 = vld [vmem:[%s1190_s5 + $0x14] ss:$8 sps:$4 sm:$0xff]  }
   0x4   :  { %730 = vmatprep.subr.bf16.mxu0 %v729_v4  ;;  %418 = vmatprep.subr.bf16.mxu1 %v766_v9  ;;  %v771_v12 = vld [vmem:[%s1190_s5 + $0x10] ss:$8 sps:$4 sm:$0xff]   ;;  %v772_v13 = vld [vmem:[%s1190_s5 + $0x24] ss:$8 sps:$4 sm:$0xff]   ;;  %v774_v14 = vld [vmem:[%s1190_s5 + $0x20] ss:$8 sps:$4 sm:$0xff]  }
   0x5   :  { %732 = vmatpush1.bf16.msra.mxu0 %v731_v6  ;;  %419 = vmatpush1.bf16.msra.mxu1 %v768_v10  ;;  %v775_v15 = vld [vmem:[%s1190_s5 + $0x34] ss:$8 sps:$4 sm:$0xff]   ;;  %v777_v16 = vld [vmem:[%s1190_s5 + $0x30] ss:$8 sps:$4 sm:$0xff]   ;;  %v778_v17 = vld [vmem:[%s1190_s5 + $0x44] ss:$8 sps:$4 sm:$0xff]  }
   0x6   :  { %420 = vmatprep.subr.bf16.mxu1 %v769_v11  ;;  %v780_v18 = vld [vmem:[%s1190_s5 + $0x40] ss:$8 sps:$4 sm:$0xff]   ;;  %v781_v19 = vld [vmem:[%s1190_s5 + $0x54] ss:$8 sps:$4 sm:$0xff]   ;;  %v783_v20 = vld [vmem:[%s1190_s5 + $0x50] ss:$8 sps:$4 sm:$0xff]  }
   0x7   :  { %v784_v21 = vld [vmem:[%s1190_s5 + $0x64] ss:$8 sps:$4 sm:$0xff]   ;;  %v786_v22 = vld [vmem:[%s1190_s5 + $0x60] ss:$8 sps:$4 sm:$0xff]   ;;  %v787_v23 = vld [vmem:[%s1190_s5 + $0x74] ss:$8 sps:$4 sm:$0xff]  }
   0x8   :  { %656 = vmatmul.mubr.msk.f32.vlgmr.msra.gmra.mrb[0].mxu0 %vm56_vm0, %v38_v7  ;;  %v789_v24 = vld [vmem:[%s1190_s5 + $0x70] ss:$8 sps:$4 sm:$0xff]   ;;  %v953_v27 = vsub.s32 0, %v47_v26  ;;  %v44_v28 = vld [vmem:[%s1191_s2] sm:$0x3]  ;;  %v958_v29 = vsub.s32 1, %v47_v26 }
   0x9   :  { %133 = vmatprep.mubr.f32.mxu0 %v826_v3  ;;  %421 = vmatpush1.bf16.msra.mxu1 %v771_v12  ;;  %v790_v48 = vld [vmem:[%s1190_s5 + $0x84] ss:$8 sps:$4 sm:$0xff]   ;;  %v792_v49 = vld [vmem:[%s1190_s5 + $0x80] ss:$8 sps:$4 sm:$0xff]   ;;  %v793_v50 = vld [vmem:[%s1190_s5 + $0x94] ss:$8 sps:$4 sm:$0xff]  }
   0xa   :  { %422 = vmatprep.subr.bf16.mxu1 %v772_v13  ;;  %v49_v30 = vrot.slane %v44_v28, %v953_v27  ;;  %v53_v31 = vrot.slane %v44_v28, %v958_v29  ;;  %v795_v51 = vld [vmem:[%s1190_s5 + $0x90] ss:$8 sps:$4 sm:$0xff]   ;;  %v796_v52 = vld [vmem:[%s1190_s5 + $0xa4] ss:$8 sps:$4 sm:$0xff]   ;;  %v798_v53 = vld [vmem:[%s1190_s5 + $0xa0] ss:$8 sps:$4 sm:$0xff]  }
   0xb   :  { %v799_v54 = vld [vmem:[%s1190_s5 + $0xb4] ss:$8 sps:$4 sm:$0xff]   ;;  %v801_v55 = vld [vmem:[%s1190_s5 + $0xb0] ss:$8 sps:$4 sm:$0xff]   ;;  %v802_v56 = vld [vmem:[%s1190_s5 + $0xc4] ss:$8 sps:$4 sm:$0xff]  }
   0xc   :  { %657 = vmatmul.mubr.msk.f32.gmra.mrb[2].mxu0 %vm56_vm0, %v39_v8  ;;  %v804_v57 = vld [vmem:[%s1190_s5 + $0xc0] ss:$8 sps:$4 sm:$0xff]   ;;  %v805_v58 = vld [vmem:[%s1190_s5 + $0xd4] ss:$8 sps:$4 sm:$0xff]   ;;  %v807_v59 = vld [vmem:[%s1190_s5 + $0xd0] ss:$8 sps:$4 sm:$0xff]  }
   0xd   :  { %423 = vmatpush1.bf16.msra.mxu1 %v774_v14  ;;  %v808_v60 = vld [vmem:[%s1190_s5 + $0xe4] ss:$8 sps:$4 sm:$0xff]   ;;  %v810_v61 = vld [vmem:[%s1190_s5 + $0xe0] ss:$8 sps:$4 sm:$0xff]   ;;  %v811_v62 = vld [vmem:[%s1190_s5 + $0xf4] ss:$8 sps:$4 sm:$0xff]  }
   0xe   :  { %424 = vmatprep.subr.bf16.mxu1 %v775_v15  ;;  %v813_v63 = vld [vmem:[%s1190_s5 + $0xf0] ss:$8 sps:$4 sm:$0xff]   ;;  %v140_v14 = vld [vmem:[%s1192_s3] sm:$0x3] }
  0x11   :  { %425 = vmatpush1.bf16.msra.mxu1 %v777_v16 }
  0x12   :  { %426 = vmatprep.subr.bf16.mxu1 %v778_v17 }
  0x15   :  { %427 = vmatpush1.bf16.msra.mxu1 %v780_v18  ;;  %v141_v18 = vld [vmem:[%s1193_s4] sm:$0x3] }
  0x16   :  { %428 = vmatprep.subr.bf16.mxu1 %v781_v19  ;;  %v182_v19 = vrot.slane %v140_v14, %v953_v27 }
  0x19   :  { %429 = vmatpush1.bf16.msra.mxu1 %v783_v20  ;;  %v186_v20 = vrot.slane %v140_v14, %v958_v29  ;;  %v554_v14 = vld [vmem:[%s1194_s9 + $0xa8] sm:$0xff] }
  0x1a   :  { %430 = vmatprep.subr.bf16.mxu1 %v784_v21 }
  0x1d   :  { %431 = vmatpush1.bf16.msra.mxu1 %v786_v22 }
  0x1e   :  { %432 = vmatprep.subr.bf16.mxu1 %v787_v23  ;;  %v197_v23 = vrot.slane %v141_v18, %v953_v27 }
  0x21   :  { %433 = vmatpush1.bf16.msra.mxu1 %v789_v24  ;;  %v201_v24 = vrot.slane %v141_v18, %v958_v29 }
  0x22   :  { %434 = vmatprep.subr.bf16.mxu1 %v790_v48  ;;  %v533_v48 = vld [vmem:[%s1194_s9] sm:$0xff] }
  0x25   :  { %435 = vmatpush1.bf16.msra.mxu1 %v792_v49 }
  0x26   :  { %436 = vmatprep.subr.bf16.mxu1 %v793_v50  ;;  %v534_v50 = vld [vmem:[%s1194_s9 + $0x8] sm:$0xff] }
  0x29   :  { %437 = vmatpush1.bf16.msra.mxu1 %v795_v51  ;;  %v735_v51 = vpack.c.bf16 %v534_v50, %v533_v48  ;;  %v547_v48 = vld [vmem:[%s1194_s9 + $0x70] sm:$0xff] }
  0x2a   :  { %438 = vmatprep.subr.bf16.mxu1 %v796_v52  ;;  %v246_v52 = vld [vmem:[%s1195_s6] sm:$0x3] }
  0x2d   :  { %439 = vmatpush1.bf16.msra.mxu1 %v798_v53  ;;  %v251_v53 = vrot.slane %v246_v52, %v953_v27 }
  0x2e   :  { %440 = vmatprep.subr.bf16.mxu1 %v799_v54  ;;  %v255_v54 = vrot.slane %v246_v52, %v958_v29 }
  0x31   :  { %441 = vmatpush1.bf16.msra.mxu1 %v801_v55 }
  0x32   :  { %442 = vmatprep.subr.bf16.mxu1 %v802_v56 }
  0x35   :  { %443 = vmatpush1.bf16.msra.mxu1 %v804_v57 }
  0x36   :  { %444 = vmatprep.subr.bf16.mxu1 %v805_v58 }
  0x39   :  { %445 = vmatpush1.bf16.msra.mxu1 %v807_v59 }
  0x3a   :  { %446 = vmatprep.subr.bf16.mxu1 %v808_v60 }
  0x3d   :  { %447 = vmatpush1.bf16.msra.mxu1 %v810_v61 }
  0x3e   :  { %448 = vmatprep.subr.bf16.mxu1 %v811_v62 }
  0x41   :  { %449 = vmatpush1.bf16.msra.mxu1 %v813_v63 }
  0xdb   :  { %v129_v32 = vpop.f32.mrb[0].mxu0 }
  0xdc   :  { %v962_v33 = vadd.f32 %v129_v32, %v49_v30  ;;  %v131_v34 = vpop.f32.mrb[1].mxu0 }
  0xdd   :  { %v964_v35 = vadd.f32 %v131_v34, %v53_v31 }
  0xde   :  { %v148_v36 = vmul.f32 %v962_v33, %v962_v33 }
  0xdf   :  { %v135_v37 = vpop.f32.mrb[2].mxu0  ;;  %v142_v38 = vadd.f32 %v964_v35, %v962_v33  ;;  %v149_v39 = vmul.f32 %v964_v35, %v964_v35 }
  0xe0   :  { %v972_v40 = vadd.f32 %v135_v37, %v49_v30  ;;  %v137_v41 = vpop.f32.mrb[3].mxu0 }
  0xe1   :  { %v974_v42 = vadd.f32 %v137_v41, %v53_v31  ;;  %143 = vadd.xlane.f32.xlu0 %v142_v38  ;;  %v152_v43 = vadd.f32 %v149_v39, %v148_v36 }
  0xe2   :  { %v150_v44 = vmul.f32 %v972_v40, %v972_v40 }
  0xe3   :  { %153 = vadd.xlane.f32.xlu1 %v152_v43  ;;  %v145_v45 = vadd.f32 %v974_v42, %v972_v40  ;;  %v151_v46 = vmul.f32 %v974_v42, %v974_v42 }
  0xe5   :  { %146 = vadd.xlane.f32.xlu0 %v145_v45  ;;  %v155_v47 = vadd.f32 %v151_v46, %v150_v44 }
  0xe7   :  { %156 = vadd.xlane.f32.xlu1 %v155_v47 }
 0x16e   :  { %v144_v0 = vpop.xlane.xlu0 %143 }
 0x16f   :  { %v158_v1 = vmul.f32 0.00390625, %v144_v0 }
 0x170   :  { %v154_v2 = vpop.xlane.xlu1 %153 }
 0x171   :  { %v160_v3 = vmul.f32 0.00390625, %v154_v2  ;;  %v162_v4 = vmul.f32 %v158_v1, %v158_v1  ;;  %v170_v15 = vsub.f32 %v962_v33, %v158_v1  ;;  %v171_v16 = vsub.f32 %v964_v35, %v158_v1 }
 0x172   :  { %v147_v5 = vpop.xlane.xlu0 %146 }
 0x173   :  { %v164_v6 = vsub.f32 %v160_v3, %v162_v4  ;;  %v159_v7 = vmul.f32 0.00390625, %v147_v5 }
 0x174   :  { %v157_v8 = vpop.xlane.xlu1 %156 }
 0x175   :  { %v166_v9 = vadd.f32 1e-05, %v164_v6  ;;  %v161_v10 = vmul.f32 0.00390625, %v157_v8  ;;  %v163_v11 = vmul.f32 %v159_v7, %v159_v7  ;;  %v172_v25 = vsub.f32 %v972_v40, %v159_v7  ;;  %v549_v40 = vld [vmem:[%s1194_s9 + $0x80] sm:$0xff]  ;;  %v552_v8 = vld [vmem:[%s1194_s9 + $0x98] sm:$0xff] }
 0x176   :  { %v173_v26 = vsub.f32 %v974_v42, %v159_v7  ;;  %v550_v42 = vld [vmem:[%s1194_s9 + $0x88] sm:$0xff]  ;;  %v551_v7 = vld [vmem:[%s1194_s9 + $0x90] sm:$0xff] }
 0x177   :  { %814 = vrsqrt.f32 %v166_v9  ;;  %v165_v12 = vsub.f32 %v161_v10, %v163_v11  ;;  %v733_v49 = vpack.c.bf16 %v550_v42, %v549_v40  ;;  %v737_v9 = vpack.c.bf16 %v552_v8, %v551_v7  ;;  %v535_v10 = vld [vmem:[%s1194_s9 + $0x10] sm:$0xff]  ;;  %v536_v11 = vld [vmem:[%s1194_s9 + $0x18] sm:$0xff] }
 0x179   :  { %v167_v13 = vadd.f32 1e-05, %v165_v12  ;;  %734 = vmatprep.subr.bf16.mxu0 %v733_v49  ;;  %v739_v12 = vpack.c.bf16 %v536_v11, %v535_v10  ;;  %v548_v49 = vld [vmem:[%s1194_s9 + $0x78] sm:$0xff] }
 0x17a   :  { %736 = vmatpush3.bf16.msra.mxu0 %v735_v51  ;;  %v763_v50 = vpack.c.bf16 %v548_v49, %v547_v48 }
 0x17b   :  { %816 = vrsqrt.f32 %v167_v13  ;;  %738 = vmatprep.subr.bf16.mxu0 %v737_v9  ;;  %v553_v13 = vld [vmem:[%s1194_s9 + $0xa0] sm:$0xff] }
 0x17e   :  { %740 = vmatpush3.bf16.msra.mxu0 %v739_v12 }
 0x181   :  { %v815_v17 = vpop.eup %814 }
 0x182   :  { %v175_v21 = vmul.f32 %v815_v17, %v171_v16  ;;  %v174_v22 = vmul.f32 %v815_v17, %v170_v15  ;;  %v741_v15 = vpack.c.bf16 %v554_v14, %v553_v13  ;;  %v537_v16 = vld [vmem:[%s1194_s9 + $0x20] sm:$0xff]  ;;  %v538_v17 = vld [vmem:[%s1194_s9 + $0x28] sm:$0xff] }
 0x183   :  { %v743_v18 = vpack.c.bf16 %v538_v17, %v537_v16 }
 0x184   :  { %v190_v28 = vmul.f32 %v186_v20, %v175_v21  ;;  %v189_v30 = vmul.f32 %v182_v19, %v174_v22  ;;  %742 = vmatprep.subr.bf16.mxu0 %v741_v15  ;;  %v539_v22 = vld [vmem:[%s1194_s9 + $0x30] sm:$0xff] }
 0x185   :  { %v817_v31 = vpop.eup %816  ;;  %744 = vmatpush3.bf16.msra.mxu0 %v743_v18 }
 0x186   :  { %v177_v32 = vmul.f32 %v817_v31, %v173_v26  ;;  %v176_v33 = vmul.f32 %v817_v31, %v172_v25  ;;  %v205_v35 = vadd.f32 %v201_v24, %v190_v28  ;;  %v204_v37 = vadd.f32 %v197_v23, %v189_v30  ;;  %v557_v25 = vld [vmem:[%s1194_s9 + $0xc0] sm:$0xff]  ;;  %v558_v26 = vld [vmem:[%s1194_s9 + $0xc8] sm:$0xff] }
 0x187   :  { %v749_v28 = vpack.c.bf16 %v558_v26, %v557_v25  ;;  %v541_v30 = vld [vmem:[%s1194_s9 + $0x40] sm:$0xff]  ;;  %v542_v31 = vld [vmem:[%s1194_s9 + $0x48] sm:$0xff] }
 0x188   :  { %v192_v34 = vmul.f32 %v186_v20, %v177_v32  ;;  %v191_v36 = vmul.f32 %v182_v19, %v176_v33  ;;  %v209_v41 = vmax.f32 %v205_v35, 0.0  ;;  %v208_v44 = vmax.f32 %v204_v37, 0.0  ;;  %v555_v19 = vld [vmem:[%s1194_s9 + $0xb0] sm:$0xff]  ;;  %v556_v20 = vld [vmem:[%s1194_s9 + $0xb8] sm:$0xff] }
 0x189   :  { %v745_v21 = vpack.c.bf16 %v556_v20, %v555_v19  ;;  %v751_v32 = vpack.c.bf16 %v542_v31, %v541_v30  ;;  %v559_v33 = vld [vmem:[%s1194_s9 + $0xd0] sm:$0xff]  ;;  %v544_v37 = vld [vmem:[%s1194_s9 + $0x58] sm:$0xff] }
 0x18a   :  { %v207_v38 = vadd.f32 %v201_v24, %v192_v34  ;;  %v206_v39 = vadd.f32 %v197_v23, %v191_v36  ;;  %v540_v23 = vld [vmem:[%s1194_s9 + $0x38] sm:$0xff]  ;;  %v543_v35 = vld [vmem:[%s1194_s9 + $0x50] sm:$0xff] }
 0x18b   :  { %v747_v24 = vpack.c.bf16 %v540_v23, %v539_v22  ;;  %746 = vmatprep.subr.bf16.mxu0 %v745_v21  ;;  %v560_v34 = vld [vmem:[%s1194_s9 + $0xd8] sm:$0xff] }
 0x18c   :  { %v211_v43 = vmax.f32 %v207_v38, 0.0  ;;  %v210_v45 = vmax.f32 %v206_v39, 0.0  ;;  %v753_v36 = vpack.c.bf16 %v560_v34, %v559_v33  ;;  %v561_v38 = vld [vmem:[%s1194_s9 + $0xe0] sm:$0xff]  ;;  %v562_v39 = vld [vmem:[%s1194_s9 + $0xe8] sm:$0xff] }
 0x18d   :  { %748 = vmatpush3.bf16.msra.mxu0 %v747_v24 }
 0x18e   :  { %v213_v46 = vpack.c.bf16 %v211_v43, %v209_v41  ;;  %v212_v47 = vpack.c.bf16 %v210_v45, %v208_v44  ;;  %750 = vmatprep.subr.bf16.mxu0 %v749_v28  ;;  %v755_v41 = vpack.c.bf16 %v544_v37, %v543_v35  ;;  %v757_v43 = vpack.c.bf16 %v562_v39, %v561_v38  ;;  %v545_v44 = vld [vmem:[%s1194_s9 + $0x60] sm:$0xff]  ;;  %v546_v45 = vld [vmem:[%s1194_s9 + $0x68] sm:$0xff] }
 0x18f   :  { %v759_v40 = vpack.c.bf16 %v546_v45, %v545_v44 }
 0x190   :  { %450 = vmatprep.mubr.bf16.mxu1 %v213_v46  ;;  %v563_v46 = vld [vmem:[%s1194_s9 + $0xf0] sm:$0xff] }
 0x191   :  { %451 = vmatmul.mubr.bf16.vlgmr.msra.gmra.mrb[0].mxu1 %v212_v47  ;;  %752 = vmatpush3.bf16.msra.mxu0 %v751_v32  ;;  %v564_v47 = vld [vmem:[%s1194_s9 + $0xf8] sm:$0xff] }
 0x192   :  { %754 = vmatprep.subr.bf16.mxu0 %v753_v36  ;;  %v761_v42 = vpack.c.bf16 %v564_v47, %v563_v46 }
 0x195   :  { %756 = vmatpush3.bf16.msra.mxu0 %v755_v41 }
 0x196   :  { %758 = vmatprep.subr.bf16.mxu0 %v757_v43 }
 0x199   :  { %760 = vmatpush3.bf16.msra.mxu0 %v759_v40 }
 0x19a   :  { %762 = vmatprep.subr.bf16.mxu0 %v761_v42 }
 0x19d   :  { %764 = vmatpush3.bf16.msra.mxu0 %v763_v50 }
 0x264   :  { %v452_v55 = vpop.f32.mrb[0].mxu1 }
 0x265   :  { %v1061_v56 = vadd.f32 %v452_v55, %v251_v53  ;;  %v454_v57 = vpop.f32.mrb[1].mxu1 }
 0x266   :  { %v1063_v58 = vadd.f32 %v454_v57, %v255_v54  ;;  %v456_v59 = vpop.f32.mrb[2].mxu1 }
 0x267   :  { %v1065_v60 = vadd.f32 %v456_v59, %v251_v53  ;;  %v458_v61 = vpop.f32.mrb[3].mxu1  ;;  %v469_v62 = vmul.f32 %v1061_v56, %v1061_v56 }
 0x268   :  { %v1069_v63 = vadd.f32 %v458_v61, %v255_v54  ;;  %v463_v0 = vadd.f32 %v1063_v58, %v1061_v56  ;;  %v470_v1 = vmul.f32 %v1063_v58, %v1063_v58 }
 0x269   :  { %v471_v3 = vmul.f32 %v1065_v60, %v1065_v60 }
 0x26a   :  { %464 = vadd.xlane.f32.xlu0 %v463_v0  ;;  %v473_v2 = vadd.f32 %v470_v1, %v469_v62  ;;  %v472_v4 = vmul.f32 %v1069_v63, %v1069_v63  ;;  %v466_v5 = vadd.f32 %v1069_v63, %v1065_v60 }
 0x26c   :  { %474 = vadd.xlane.f32.xlu1 %v473_v2  ;;  %v476_v6 = vadd.f32 %v472_v4, %v471_v3 }
 0x26e   :  { %467 = vadd.xlane.f32.xlu0 %v466_v5  ;;  %v461_v5 = vld [vmem:[%s1196_s7] sm:$0x3] }
 0x26f   :  { %v503_v9 = vrot.slane %v461_v5, %v953_v27  ;;  %v507_v10 = vrot.slane %v461_v5, %v958_v29 }
 0x270   :  { %477 = vadd.xlane.f32.xlu1 %v476_v6  ;;  %v462_v6 = vld [vmem:[%s1197_s8] sm:$0x3] }
 0x271   :  { %v518_v14 = vrot.slane %v462_v6, %v953_v27  ;;  %v522_v15 = vrot.slane %v462_v6, %v958_v29 }
 0x2f7   :  { %v465_v51 = vpop.xlane.xlu0 %464 }
 0x2f8   :  { %v479_v52 = vmul.f32 0.00390625, %v465_v51 }
 0x2f9   :  { %v475_v53 = vpop.xlane.xlu1 %474 }
 0x2fa   :  { %v481_v54 = vmul.f32 0.00390625, %v475_v53  ;;  %v483_v55 = vmul.f32 %v479_v52, %v479_v52  ;;  %v491_v7 = vsub.f32 %v1061_v56, %v479_v52  ;;  %v492_v8 = vsub.f32 %v1063_v58, %v479_v52 }
 0x2fb   :  { %v468_v57 = vpop.xlane.xlu0 %467 }
 0x2fc   :  { %v485_v59 = vsub.f32 %v481_v54, %v483_v55  ;;  %v480_v61 = vmul.f32 0.00390625, %v468_v57 }
 0x2fd   :  { %v478_v62 = vpop.xlane.xlu1 %477 }
 0x2fe   :  { %v487_v0 = vadd.f32 1e-05, %v485_v59  ;;  %v482_v1 = vmul.f32 0.00390625, %v478_v62  ;;  %v484_v2 = vmul.f32 %v480_v61, %v480_v61  ;;  %v493_v18 = vsub.f32 %v1065_v60, %v480_v61 }
 0x2ff   :  { %v494_v19 = vsub.f32 %v1069_v63, %v480_v61  ;;  %v690_v63 = vld [vmem:[%s1198_s10] ss:$0 sm:$0xff] }
 0x300   :  { %818 = vrsqrt.f32 %v487_v0  ;;  %v486_v3 = vsub.f32 %v482_v1, %v484_v2 }
 0x302   :  { %v488_v4 = vadd.f32 1e-05, %v486_v3 }
 0x304   :  { %820 = vrsqrt.f32 %v488_v4 }
 0x30a   :  { %v819_v11 = vpop.eup %818 }
 0x30b   :  { %v495_v12 = vmul.f32 %v819_v11, %v491_v7  ;;  %v496_v13 = vmul.f32 %v819_v11, %v492_v8 }
 0x30d   :  { %v510_v16 = vmul.f32 %v503_v9, %v495_v12  ;;  %v511_v17 = vmul.f32 %v507_v10, %v496_v13 }
 0x30e   :  { %v821_v56 = vpop.eup %820 }
 0x30f   :  { %v525_v20 = vadd.f32 %v518_v14, %v510_v16  ;;  %v526_v58 = vadd.f32 %v522_v15, %v511_v17  ;;  %v498_v21 = vmul.f32 %v821_v56, %v494_v19  ;;  %v497_v22 = vmul.f32 %v821_v56, %v493_v18 }
 0x311   :  { %v529_v23 = vmax.f32 %v525_v20, 0.0  ;;  %v530_v24 = vmax.f32 %v526_v58, 0.0  ;;  %v513_v25 = vmul.f32 %v507_v10, %v498_v21  ;;  %v512_v26 = vmul.f32 %v503_v9, %v497_v22 }
 0x313   :  { %636 = vmatprep.mubr.f32.mxu0 %v530_v24  ;;  %v528_v27 = vadd.f32 %v522_v15, %v513_v25  ;;  %v527_v28 = vadd.f32 %v518_v14, %v512_v26 }
 0x314   :  { %637 = vmatmul.mubr.f32.vlgmr.msra.gmra.mrb[4].mxu0 %v529_v23 }
 0x315   :  { %v532_v29 = vmax.f32 %v528_v27, 0.0  ;;  %v531_v30 = vmax.f32 %v527_v28, 0.0 }
 0x317   :  { %641 = vmatprep.mubr.f32.mxu0 %v532_v29 }
 0x318   :  { %642 = vmatmul.mubr.f32.gmra.mrb[6].mxu0 %v531_v30 }
 0x3e7   :  { %v723_v60 = vpop.f32.mrb[4].mxu0 }
 0x3e8   :  { %v724_v31 = vpop.f32.mrb[5].mxu0 }
 0x3e9   :  { %v725_v32 = vadd.f32 %v724_v31, %v723_v60 }
 0x3eb   :  { %v639_v33 = vadd.f32 %v725_v32, %v690_v63  ;;  %v726_v34 = vpop.f32.mrb[6].mxu0 }
 0x3ec   :  { %v727_v35 = vpop.f32.mrb[7].mxu0 }
 0x3ed   :  { %822 = vtanh.f32 %v639_v33  ;;  %v728_v36 = vadd.f32 %v727_v35, %v726_v34 }
 0x3ef   :  { %v644_v37 = vadd.f32 %v728_v36, %v690_v63 }
 0x3f1   :  { %824 = vtanh.f32 %v644_v37 }
 0x3f7   :  { %v823_v38 = vpop.eup %822 }
 0x3f8   :  { %650 = vst.msk [vmem:[%s1199_s11] sm:$0xff] %vm649_vm1, %v823_v38 }
 0x3fb   :  { %v825_v39 = vpop.eup %824 }
 0x3fc   :  { %651 = vst.msk [vmem:[%s1199_s11 + $0x8] sm:$0xff] %vm649_vm1, %v825_v39 }

</bundles_post_ra>
